<compile_context>
chip_gen: v7x
topology: tpu7x:2x2x1
jax: 0.10.0
libtpu: 0.0.40
codegen_flags: <defaults>
</compile_context>

<pallas_src>
import jax
import jax.numpy as jnp
from jax import lax
from jax.experimental import pallas as pl
from jax.experimental.pallas import tpu as pltpu

# Module hyper-params (c_dim == hidden_size == 32, n_blocks=5, skips=[2], color=False).
C_DIM = 32
HIDDEN = 32
N_BLOCKS = 5
SKIPS = (2,)

LANE = 128
TM = 1024                 # points per grid step (points live on the lane axis)
N_WROWS = 6 * HIDDEN      # [w0, w1, w2, w3 (64 rows), w4] stacked -> (192, 32)
AUX_COLS = 8              # columns: [b0..b4, wo, pad, pad] -> (32, 8)


# ---------------------------------------------------------------------------
# Pallas kernel: full 5-block MLP + fused K=64 skip + output head.
# ---------------------------------------------------------------------------
def mlp_kernel(c_ref, w_ref, aux_ref, bo_ref, out_ref):
    """One (C_DIM, TM) tile of points through the whole MLP.

    Layout: features on sublanes, points on lanes.  Every layer is
    dot_general(W (K,32), x (K,TM)) contracting the K (sublane) axis of both
    operands -> (32, TM), i.e. W^T @ x with no activation transposes.
    """
    wdt = w_ref.dtype
    c = c_ref[...]                                            # (C_DIM, TM)

    def dense_relu(x, row0, k, b_idx):
        w = w_ref[row0:row0 + k, :]                           # (K, 32) (in, out)
        b = aux_ref[:, b_idx:b_idx + 1]                       # (32, 1)  f32
        y = lax.dot_general(w, x, (((0,), (0,)), ((), ())),
                            preferred_element_type=jnp.float32)   # (32, TM) f32
        return jnp.maximum(y + b, 0.0).astype(wdt)

    h = dense_relu(c, 0 * HIDDEN, HIDDEN, 0)
    h = dense_relu(h, 1 * HIDDEN, HIDDEN, 1)
    h = dense_relu(h, 2 * HIDDEN, HIDDEN, 2)

    # Skip after layer 2: relu(W3 @ cat([c, h])) as a single K=64 contraction.
    ch = jnp.concatenate([c, h], axis=0)                      # (2*HIDDEN, TM)
    h = dense_relu(ch, 3 * HIDDEN, 2 * HIDDEN, 3)
    h = dense_relu(h, 5 * HIDDEN, HIDDEN, 4)

    # Output head: wo(32,1) contracted with h(32,TM) over features -> (1, TM),
    # already lane-dense.  Scalar output bias comes from SMEM.
    wo = aux_ref[:, 5:6]                                      # (32, 1) f32
    out_row = lax.dot_general(wo, h.astype(jnp.float32),
                              (((0,), (0,)), ((), ())),
                              preferred_element_type=jnp.float32)  # (1, TM)
    out_ref[...] = out_row + bo_ref[0, 0]


def _round_up(x, m):
    return ((x + m - 1) // m) * m


def _pick_tile(n):
    """Largest lane-aligned tile <= TM, preferring >= 2 grid steps (v7x: 2 TCs)."""
    if n > TM:
        return TM
    return max(LANE, _round_up(-(-n // 2), LANE))


def mlp_no_xyz_pallas(ct, wslab, aux, bo, *, compute_dtype=jnp.float32):
    """ct: (C_DIM, N) sampled features (features-major) -> (N,) occupancy."""
    cdim, n = ct.shape
    assert cdim == C_DIM and HIDDEN == C_DIM
    ct = ct.astype(compute_dtype)
    wslab = wslab.astype(compute_dtype)

    tm = _pick_tile(n)
    n_pad = _round_up(n, tm)
    if n_pad != n:
        ct = jnp.pad(ct, ((0, 0), (0, n_pad - n)))
    grid = n_pad // tm

    out = pl.pallas_call(
        mlp_kernel,
        out_shape=jax.ShapeDtypeStruct((1, n_pad), jnp.float32),
        grid_spec=pltpu.PrefetchScalarGridSpec(
            num_scalar_prefetch=0,
            grid=(grid,),
            in_specs=[
                pl.BlockSpec((C_DIM, tm), lambda i: (0, i)),
                # grid-invariant weight / bias slabs (full-array blocks)
                pl.BlockSpec((N_WROWS, HIDDEN), lambda i: (0, 0)),
                pl.BlockSpec((HIDDEN, AUX_COLS), lambda i: (0, 0)),
                # scalar output bias lives in SMEM
                pl.BlockSpec(memory_space=pltpu.MemorySpace.SMEM),
            ],
            out_specs=pl.BlockSpec((1, tm), lambda i: (0, i)),
        ),
        compiler_params=pltpu.CompilerParams(dimension_semantics=("parallel",)),
    )(ct, wslab, aux, bo)
    return out[0, :n]


# ---------------------------------------------------------------------------
# Plain-JAX glue: deterministic parameter init, packing, grid-feature sampling.
# ---------------------------------------------------------------------------
def xavier_uniform(key, in_dim, out_dim, gain):
    limit = gain * (6.0 / (in_dim + out_dim)) ** 0.5
    # stored as (in, out); the kernel contracts the in-axis directly
    return jax.random.uniform(key, (in_dim, out_dim), jnp.float32, -limit, limit)


def init_params(key):
    relu_gain = 2.0 ** 0.5  # torch.nn.init.calculate_gain('relu')
    keys = jax.random.split(key, N_BLOCKS + 1)
    in_dims = [HIDDEN] + [HIDDEN + C_DIM if i in SKIPS else HIDDEN
                          for i in range(N_BLOCKS - 1)]
    pts = []
    for i, ind in enumerate(in_dims):
        w = xavier_uniform(keys[i], ind, HIDDEN, relu_gain)
        b = jnp.zeros((HIDDEN,), jnp.float32)     # torch zeros_ init
        pts.append((w, b))
    wo = xavier_uniform(keys[-1], HIDDEN, 1, 1.0)  # gain('linear') = 1
    bo = jnp.zeros((1, 1), jnp.float32)
    return {"pts": pts, "out": (wo, bo)}


def pack_params(params):
    """Pack into [wslab (192,32) weights, aux (32,8) bias/head cols, bo (1,1)]."""
    ws = [w for (w, _) in params["pts"]]
    bs = [b for (_, b) in params["pts"]]
    wo, bo = params["out"]
    wslab = jnp.concatenate(ws, axis=0)                          # (192, 32) (in,out)
    cols = ([b.reshape(HIDDEN, 1) for b in bs]
            + [wo.reshape(HIDDEN, 1),
               jnp.zeros((HIDDEN, AUX_COLS - N_BLOCKS - 1), jnp.float32)])
    aux = jnp.concatenate(cols, axis=1)                          # (32, 8) f32
    return wslab, aux, bo


def normalize_3d_coordinate(p, bound):
    p = p.reshape(-1, 3)
    return (p - bound[:, 0]) / (bound[:, 1] - bound[:, 0]) * 2.0 - 1.0


def sample_grid_feature_t(p, grid_feature, bound):
    """Trilinear F.grid_sample emulation (align_corners=True, border padding).

    grid_feature: (1, C, D, H, W); p: (N, 3) world coords.  Returns (C, N) --
    already in the kernel's features-on-sublanes layout, no extra transpose.
    """
    # TODO(synk): the data-dependent trilinear gather stays in plain JAX
    # (no clean Pallas TPU gather for scattered 3-D indices).
    p_nor = normalize_3d_coordinate(p, bound)           # (N, 3), xyz in [-1, 1]
    g = grid_feature[0]                                 # (C, D, H, W)
    _, D, H, W = g.shape
    x, y, z = p_nor[:, 0], p_nor[:, 1], p_nor[:, 2]
    ix = jnp.clip((x + 1.0) * 0.5 * (W - 1), 0.0, W - 1)
    iy = jnp.clip((y + 1.0) * 0.5 * (H - 1), 0.0, H - 1)
    iz = jnp.clip((z + 1.0) * 0.5 * (D - 1), 0.0, D - 1)
    x0f, y0f, z0f = jnp.floor(ix), jnp.floor(iy), jnp.floor(iz)
    wx, wy, wz = (ix - x0f)[None, :], (iy - y0f)[None, :], (iz - z0f)[None, :]
    x0 = x0f.astype(jnp.int32)
    y0 = y0f.astype(jnp.int32)
    z0 = z0f.astype(jnp.int32)
    x1 = jnp.clip(x0 + 1, 0, W - 1)
    y1 = jnp.clip(y0 + 1, 0, H - 1)
    z1 = jnp.clip(z0 + 1, 0, D - 1)

    def gat(zz, yy, xx):
        return g[:, zz, yy, xx]                         # (C, N)

    c = (gat(z0, y0, x0) * (1 - wz) * (1 - wy) * (1 - wx)
         + gat(z0, y0, x1) * (1 - wz) * (1 - wy) * wx
         + gat(z0, y1, x0) * (1 - wz) * wy * (1 - wx)
         + gat(z0, y1, x1) * (1 - wz) * wy * wx
         + gat(z1, y0, x0) * wz * (1 - wy) * (1 - wx)
         + gat(z1, y0, x1) * wz * (1 - wy) * wx
         + gat(z1, y1, x0) * wz * wy * (1 - wx)
         + gat(z1, y1, x1) * wz * wy * wx)
    return c                                            # (C, N)


def mlp_no_xyz_forward(p, grid_feature, bound, params, *,
                       compute_dtype=jnp.float32):
    ct = sample_grid_feature_t(p, grid_feature, bound)  # (c_dim, N)
    wslab, aux, bo = pack_params(params)
    return mlp_no_xyz_pallas(ct, wslab, aux, bo, compute_dtype=compute_dtype)


def mlp_reference(c, params):
    """c: (N, c_dim) row-major pure-JAX reference of the PyTorch forward."""
    h = c
    for i, (w, b) in enumerate(params["pts"]):
        h = jnp.maximum(h @ w + b, 0.0)
        if i in SKIPS:
            h = jnp.concatenate([c, h], axis=-1)
    wo, bo = params["out"]
    return (h @ wo + bo)[:, 0]


if __name__ == "__main__":
    key = jax.random.PRNGKey(0)
    k_p, k_grid, k_par = jax.random.split(key, 3)

    N_PTS = 1000  # NOT a tile multiple -> exercises padding and the G>=2 tile pick
    bound = jnp.array([[-1.0, 1.0], [-1.0, 1.0], [-1.0, 1.0]], jnp.float32)
    p = jax.random.uniform(k_p, (N_PTS, 3), jnp.float32, -1.0, 1.0)
    grid_feature = jax.random.normal(k_grid, (1, C_DIM, 8, 8, 8), jnp.float32)
    params = init_params(k_par)

    out = mlp_no_xyz_forward(p, grid_feature, bound, params)
    out = jax.block_until_ready(out)

    # correctness: fused Pallas MLP vs pure-JAX row-major reference
    ct = sample_grid_feature_t(p, grid_feature, bound)
    ref = mlp_reference(ct.T, params)
    assert out.shape == (N_PTS,)
    assert jnp.allclose(out, ref, atol=1e-4, rtol=1e-4), \
        float(jnp.max(jnp.abs(out - ref)))

    # bf16 matmul-input fast path (v6e/v7x MXU); f32 accumulation, loose check.
    out_bf16 = mlp_no_xyz_forward(p, grid_feature, bound, params,
                                  compute_dtype=jnp.bfloat16)
    out_bf16 = jax.block_until_ready(out_bf16)
    assert jnp.allclose(out_bf16, ref, atol=2e-1, rtol=2e-1), \
        float(jnp.max(jnp.abs(out_bf16 - ref)))

    print("KERNEL_OK")
</pallas_src>

<mosaic_0001>
module attributes {stable_mosaic.version = 11 : i64} {
  func.func @mlp_kernel(%arg0: i32, %arg1: memref<32x512xf32, #tpu.memory_space<vmem>>, %arg2: memref<192x32xf32, #tpu.memory_space<vmem>>, %arg3: memref<32x8xf32, #tpu.memory_space<vmem>>, %arg4: memref<1x1xf32, #tpu.memory_space<smem>>, %arg5: memref<1x512xf32, #tpu.memory_space<vmem>>) attributes {dimension_semantics = [#tpu.dimension_semantics<parallel>], iteration_bounds = array<i64: 2>, scalar_prefetch = 0 : i64, scratch_operands = 0 : i64, tpu.core_type = #tpu.core_type<tc>, window_params = [{transform_indices = @transform_0, window_bounds = array<i64: 32, 512>}, {pipeline_mode = #tpu.pipeline_mode<synchronous>, transform_indices = @transform_1, window_bounds = array<i64: 192, 32>}, {pipeline_mode = #tpu.pipeline_mode<synchronous>, transform_indices = @transform_2, window_bounds = array<i64: 32, 8>}, {transform_indices = @transform_3, window_bounds = array<i64: 1, 1>}, {transform_indices = @transform_4, window_bounds = array<i64: 1, 512>}]} {
    %c0 = arith.constant 0 : index
    %c0_0 = arith.constant 0 : index
    %0 = vector.load %arg1[%c0, %c0_0] : memref<32x512xf32, #tpu.memory_space<vmem>>, vector<32x512xf32>
    %c0_1 = arith.constant 0 : index
    %c0_2 = arith.constant 0 : index
    %1 = vector.load %arg2[%c0_1, %c0_2] : memref<192x32xf32, #tpu.memory_space<vmem>>, vector<32x32xf32>
    %c0_3 = arith.constant 0 : index
    %c0_4 = arith.constant 0 : index
    %2 = vector.load %arg3[%c0_3, %c0_4] : memref<32x8xf32, #tpu.memory_space<vmem>>, vector<32x1xf32>
    %cst = arith.constant dense<0.000000e+00> : vector<32x512xf32>
    %3 = tpu.matmul %1, %0, %cst {dimension_numbers = #tpu.dot_dimension_numbers<[0], [0], [1], [1], [0, 1, 1, 1], [], []>} : vector<32x32xf32>, vector<32x512xf32>, vector<32x512xf32> -> vector<32x512xf32>
    %4 = vector.broadcast %2 : vector<32x1xf32> to vector<32x512xf32>
    %5 = arith.addf %3, %4 : vector<32x512xf32>
    %cst_5 = arith.constant 0.000000e+00 : f32
    %6 = vector.broadcast %cst_5 : f32 to vector<32x512xf32>
    %7 = arith.maximumf %5, %6 : vector<32x512xf32>
    %c32 = arith.constant 32 : index
    %c0_6 = arith.constant 0 : index
    %8 = vector.load %arg2[%c32, %c0_6] : memref<192x32xf32, #tpu.memory_space<vmem>>, vector<32x32xf32>
    %c0_7 = arith.constant 0 : index
    %c1 = arith.constant 1 : index
    %9 = vector.load %arg3[%c0_7, %c1] : memref<32x8xf32, #tpu.memory_space<vmem>>, vector<32x1xf32>
    %cst_8 = arith.constant dense<0.000000e+00> : vector<32x512xf32>
    %10 = tpu.matmul %8, %7, %cst_8 {dimension_numbers = #tpu.dot_dimension_numbers<[0], [0], [1], [1], [0, 1, 1, 1], [], []>} : vector<32x32xf32>, vector<32x512xf32>, vector<32x512xf32> -> vector<32x512xf32>
    %11 = vector.broadcast %9 : vector<32x1xf32> to vector<32x512xf32>
    %12 = arith.addf %10, %11 : vector<32x512xf32>
    %cst_9 = arith.constant 0.000000e+00 : f32
    %13 = vector.broadcast %cst_9 : f32 to vector<32x512xf32>
    %14 = arith.maximumf %12, %13 : vector<32x512xf32>
    %c64 = arith.constant 64 : index
    %c0_10 = arith.constant 0 : index
    %15 = vector.load %arg2[%c64, %c0_10] : memref<192x32xf32, #tpu.memory_space<vmem>>, vector<32x32xf32>
    %c0_11 = arith.constant 0 : index
    %c2 = arith.constant 2 : index
    %16 = vector.load %arg3[%c0_11, %c2] : memref<32x8xf32, #tpu.memory_space<vmem>>, vector<32x1xf32>
    %cst_12 = arith.constant dense<0.000000e+00> : vector<32x512xf32>
    %17 = tpu.matmul %15, %14, %cst_12 {dimension_numbers = #tpu.dot_dimension_numbers<[0], [0], [1], [1], [0, 1, 1, 1], [], []>} : vector<32x32xf32>, vector<32x512xf32>, vector<32x512xf32> -> vector<32x512xf32>
    %18 = vector.broadcast %16 : vector<32x1xf32> to vector<32x512xf32>
    %19 = arith.addf %17, %18 : vector<32x512xf32>
    %cst_13 = arith.constant 0.000000e+00 : f32
    %20 = vector.broadcast %cst_13 : f32 to vector<32x512xf32>
    %21 = arith.maximumf %19, %20 : vector<32x512xf32>
    %22 = tpu.concatenate %0, %21 in 0 : vector<32x512xf32>, vector<32x512xf32> -> vector<64x512xf32>
    %c96 = arith.constant 96 : index
    %c0_14 = arith.constant 0 : index
    %23 = vector.load %arg2[%c96, %c0_14] : memref<192x32xf32, #tpu.memory_space<vmem>>, vector<64x32xf32>
    %c0_15 = arith.constant 0 : index
    %c3 = arith.constant 3 : index
    %24 = vector.load %arg3[%c0_15, %c3] : memref<32x8xf32, #tpu.memory_space<vmem>>, vector<32x1xf32>
    %cst_16 = arith.constant dense<0.000000e+00> : vector<32x512xf32>
    %25 = tpu.matmul %23, %22, %cst_16 {dimension_numbers = #tpu.dot_dimension_numbers<[0], [0], [1], [1], [0, 1, 1, 1], [], []>} : vector<64x32xf32>, vector<64x512xf32>, vector<32x512xf32> -> vector<32x512xf32>
    %26 = vector.broadcast %24 : vector<32x1xf32> to vector<32x512xf32>
    %27 = arith.addf %25, %26 : vector<32x512xf32>
    %cst_17 = arith.constant 0.000000e+00 : f32
    %28 = vector.broadcast %cst_17 : f32 to vector<32x512xf32>
    %29 = arith.maximumf %27, %28 : vector<32x512xf32>
    %c160 = arith.constant 160 : index
    %c0_18 = arith.constant 0 : index
    %30 = vector.load %arg2[%c160, %c0_18] : memref<192x32xf32, #tpu.memory_space<vmem>>, vector<32x32xf32>
    %c0_19 = arith.constant 0 : index
    %c4 = arith.constant 4 : index
    %31 = vector.load %arg3[%c0_19, %c4] : memref<32x8xf32, #tpu.memory_space<vmem>>, vector<32x1xf32>
    %cst_20 = arith.constant dense<0.000000e+00> : vector<32x512xf32>
    %32 = tpu.matmul %30, %29, %cst_20 {dimension_numbers = #tpu.dot_dimension_numbers<[0], [0], [1], [1], [0, 1, 1, 1], [], []>} : vector<32x32xf32>, vector<32x512xf32>, vector<32x512xf32> -> vector<32x512xf32>
    %33 = vector.broadcast %31 : vector<32x1xf32> to vector<32x512xf32>
    %34 = arith.addf %32, %33 : vector<32x512xf32>
    %cst_21 = arith.constant 0.000000e+00 : f32
    %35 = vector.broadcast %cst_21 : f32 to vector<32x512xf32>
    %36 = arith.maximumf %34, %35 : vector<32x512xf32>
    %c0_22 = arith.constant 0 : index
    %c5 = arith.constant 5 : index
    %37 = vector.load %arg3[%c0_22, %c5] : memref<32x8xf32, #tpu.memory_space<vmem>>, vector<32x1xf32>
    %cst_23 = arith.constant dense<0.000000e+00> : vector<1x512xf32>
    %38 = tpu.matmul %37, %36, %cst_23 {dimension_numbers = #tpu.dot_dimension_numbers<[0], [0], [1], [1], [0, 1, 1, 1], [], []>} : vector<32x1xf32>, vector<32x512xf32>, vector<1x512xf32> -> vector<1x512xf32>
    %c0_24 = arith.constant 0 : index
    %c0_25 = arith.constant 0 : index
    %39 = memref.load %arg4[%c0_24, %c0_25] : memref<1x1xf32, #tpu.memory_space<smem>>
    %40 = vector.broadcast %39 : f32 to vector<1x512xf32>
    %41 = arith.addf %38, %40 : vector<1x512xf32>
    %c0_26 = arith.constant 0 : index
    %c0_27 = arith.constant 0 : index
    %42 = vector.load %arg5[%c0_26, %c0_27] : memref<1x512xf32, #tpu.memory_space<vmem>>, vector<1x512xf32>
    tpu.vector_store %arg5[%c0_26, %c0_27], %41 {strides = array<i32>} : memref<1x512xf32, #tpu.memory_space<vmem>>, vector<1x512xf32>,
    return
  }
  func.func @transform_0(%arg0: i32) -> (i32, i32) {
    %c0_i32 = arith.constant 0 : i32
    %c0_i32_0 = arith.constant 0 : i32
    return %c0_i32, %arg0 : i32, i32
  }
  func.func @transform_1(%arg0: i32) -> (i32, i32) {
    %c0_i32 = arith.constant 0 : i32
    %c0_i32_0 = arith.constant 0 : i32
    %c0_i32_1 = arith.constant 0 : i32
    return %c0_i32, %c0_i32_0 : i32, i32
  }
  func.func @transform_2(%arg0: i32) -> (i32, i32) {
    %c0_i32 = arith.constant 0 : i32
    %c0_i32_0 = arith.constant 0 : i32
    %c0_i32_1 = arith.constant 0 : i32
    return %c0_i32, %c0_i32_0 : i32, i32
  }
  func.func @transform_3(%arg0: i32) -> (i32, i32) {
    %c0_i32 = arith.constant 0 : i32
    %c0_i32_0 = arith.constant 0 : i32
    %c0_i32_1 = arith.constant 0 : i32
    return %c0_i32, %c0_i32_0 : i32, i32
  }
  func.func @transform_4(%arg0: i32) -> (i32, i32) {
    %c0_i32 = arith.constant 0 : i32
    %c0_i32_0 = arith.constant 0 : i32
    return %c0_i32, %arg0 : i32, i32
  }
}

</mosaic_0001>

<bundles_post_ra>
// kernel: tpu_custom_call.1
= control target key start
LH: loop header
LB: loop body
LE: loop exit
PB: predicated region body
PF: predicated region fallthrough
CT: control target
= control target key end

     0   :  { %s2573_s0 = inlined_call_operand.vmem [shape: f32[32,1024], index: 0, kind: input, shape index: {}]   ;;  %s2574_s1 = inlined_call_operand.vmem [shape: f32[192,32], index: 1, kind: input, shape index: {}]   ;;  %s2575_s2 = inlined_call_operand.vmem [shape: f32[32,8], index: 2, kind: input, shape index: {}]   ;;  %s2576_s3 = inlined_call_operand.<no memory space> [shape: f32[1,1], index: 3, kind: input, shape index: {}]   ;;  %s2577_s4 = inlined_call_operand.hbm [shape: f32[1,1024], index: 4, kind: output, shape index: {}]  }
   0x1   :  { %9 = sst [smem:[#allocation2]] %s2576_s3 }
   0x2   :  { %10 = vsyncpa [#allocation5], 0 }
   0x3   :  { %12 = vsyncpa [#allocation5 + $0x1], 0  ;;  %s2197_s17 = smov 0   ;;  %s2199_s18 = smov 0  }
   0x4   :  { %s2201_s19 = smov 0   ;;  %s2203_s20 = smov 0  }
   0x5 LB: > { %s1873_s3 = sadd.s32 4294967295, %s2158_s20   ;;  %s1874_s21 = sadd.s32 4294967294, %s2158_s20   ;;  %s2158_s20 = sphi %s2203_s20, %s2583_s20   ;;  %s2154_s19 = sphi %s2201_s19, %s2582_s19   ;;  %s2150_s18 = sphi %s2199_s18, %s2581_s18   ;;  %s2146_s17 = sphi %s2197_s17, %s2580_s17  }
   0x6   : > { %s2220_s22 = sadd.s32 1, %s2158_s20   ;;  %s25_s23 = sadd.s32 1, %s2154_s19 }
   0x7   : > { %s22_s24 = ssub.s32 %s2158_s20, %s2220_s22  ;;  %p32_p0 = scmp.ne.s32.totalorder %s2154_s19, %s2150_s18 }
   0x8   : > { %p23_p1 = scmp.eq.s32.totalorder %s22_s24, 0  ;;  %p33_p2 = scmp.eq.s32.totalorder %s2158_s20, 0 }
   0x9   : > { %p125_p3 = scmp.eq.s32.totalorder %s1873_s3, 1  ;;  %p130_p4 = scmp.ne.s32.totalorder %s2150_s18, %s2146_s17 }
   0xa   : > { %s2233_s25 = scalar_select %p23_p1, %s2154_s19, %s25_s23  }
   0xb   : > { %p34_p5 = por %p33_p2, %p32_p0  ;;  %p2235_p6 = por %p125_p3, %p32_p0 }
   0xc   : > { %p131_p7 = scmp.eq.s32.totalorder %s1874_s21, 1  ;;  %p1876_p9 = scmp.ge.s32.totalorder %s2158_s20, 2 }
   0xe   : > { %p2239_p8 = por %p131_p7, %p130_p4  ;;  %156 = sbr.rel (%p1876_p9) target bundleno = 33 (0x21), region = 28 }
  0x15   : > { %159 = sbr.rel (!%p34_p5) target bundleno = 33 (0x21), region = 32  ;;  %s161_s28 = sand.u32 (%p34_p5), 1, %s2154_s19  }
  0x16   : > { %s1930_s29 = sshll.u32 (%p34_p5), %s2158_s20, 5  ;;  %s1877_s30 = sshll.u32 (%p34_p5), %s161_s28, 7 }
  0x17   : > { %s2251_s7 = scalar_lea.vmem (%p34_p5), %s2573_s0, %s1930_s29  ;;  %s163_s8 = scalar_lea.vmem (%p34_p5), [#allocation3], %s1877_s30 }
  0x18   : > { %v179_v0 = vld [vmem:[%s2251_s7] sm:$0xff] (%p34_p5)  ;;  %v181_v1 = vld [vmem:[%s2251_s7 + $0x8] sm:$0xff] (%p34_p5)  ;;  %v183_v2 = vld [vmem:[%s2251_s7 + $0x10] sm:$0xff] (%p34_p5) }
  0x19   : > { %180 = vst [vmem:[%s163_s8] sm:$0xff] (%p34_p5), %v179_v0  ;;  %182 = vst [vmem:[%s163_s8 + $0x8] sm:$0xff] (%p34_p5), %v181_v1  ;;  %v185_v3 = vld [vmem:[%s2251_s7 + $0x18] sm:$0xff] (%p34_p5)  ;;  %v187_v4 = vld [vmem:[%s2251_s7 + $0x40] sm:$0xff] (%p34_p5) }
  0x1a   : > { %184 = vst [vmem:[%s163_s8 + $0x10] sm:$0xff] (%p34_p5), %v183_v2  ;;  %v189_v5 = vld [vmem:[%s2251_s7 + $0x48] sm:$0xff] (%p34_p5)  ;;  %186 = vst [vmem:[%s163_s8 + $0x18] sm:$0xff] (%p34_p5), %v185_v3  ;;  %v191_v6 = vld [vmem:[%s2251_s7 + $0x50] sm:$0xff] (%p34_p5) }
  0x1b   : > { %188 = vst [vmem:[%s163_s8 + $0x20] sm:$0xff] (%p34_p5), %v187_v4  ;;  %190 = vst [vmem:[%s163_s8 + $0x28] sm:$0xff] (%p34_p5), %v189_v5  ;;  %v193_v7 = vld [vmem:[%s2251_s7 + $0x58] sm:$0xff] (%p34_p5)  ;;  %v195_v8 = vld [vmem:[%s2251_s7 + $0x80] sm:$0xff] (%p34_p5) }
  0x1c   : > { %192 = vst [vmem:[%s163_s8 + $0x30] sm:$0xff] %v191_v6  ;;  %194 = vst [vmem:[%s163_s8 + $0x38] sm:$0xff] %v193_v7  ;;  %v197_v9 = vld [vmem:[%s2251_s7 + $0x88] sm:$0xff]  ;;  %v199_v10 = vld [vmem:[%s2251_s7 + $0x90] sm:$0xff] }
  0x1d   : > { %196 = vst [vmem:[%s163_s8 + $0x40] sm:$0xff] %v195_v8  ;;  %v201_v11 = vld [vmem:[%s2251_s7 + $0x98] sm:$0xff]  ;;  %198 = vst [vmem:[%s163_s8 + $0x48] sm:$0xff] %v197_v9  ;;  %v203_v12 = vld [vmem:[%s2251_s7 + $0xc0] sm:$0xff] }
  0x1e   : > { %200 = vst [vmem:[%s163_s8 + $0x50] sm:$0xff] %v199_v10  ;;  %202 = vst [vmem:[%s163_s8 + $0x58] sm:$0xff] %v201_v11  ;;  %v205_v13 = vld [vmem:[%s2251_s7 + $0xc8] sm:$0xff]  ;;  %v207_v14 = vld [vmem:[%s2251_s7 + $0xd0] sm:$0xff] }
  0x1f   : > { %204 = vst [vmem:[%s163_s8 + $0x60] sm:$0xff] %v203_v12  ;;  %206 = vst [vmem:[%s163_s8 + $0x68] sm:$0xff] %v205_v13  ;;  %v209_v15 = vld [vmem:[%s2251_s7 + $0xd8] sm:$0xff] }
  0x20   : > { %208 = vst [vmem:[%s163_s8 + $0x70] sm:$0xff] %v207_v14  ;;  %210 = vst [vmem:[%s163_s8 + $0x78] sm:$0xff] %v209_v15 }
  0x21 PF: > { %p1880_p10 = scmp.ge.s32.totalorder %s2158_s20, 1  ;;  %p215_p11 = scmp.lt.s32.totalorder %s2158_s20, 3 }
  0x23   : > { %p216_p12 = pnand %p1880_p10, %p215_p11 }
  0x24   : > { %v265_v16 = vld [vmem:[%s2574_s1] sm:$0xff] (!%p216_p12)  ;;  %s2275_s11 = sand.u32 (!%p216_p12), 1, %s2150_s18   ;;  %v2160_v17 = vmov (!%p216_p12), 0.0   ;;  %v266_v18 = vld [vmem:[%s2574_s1 + $0x8] sm:$0xff] (!%p216_p12)  ;;  %v267_v22 = vld [vmem:[%s2574_s1 + $0x10] sm:$0xff] (!%p216_p12)  ;;  %v2161_v46 = vmov (!%p216_p12), 0  }
  0x25   : > { %219 = sbr.rel (%p216_p12) target bundleno = 1578 (0x62a), region = 55  ;;  %293 = vxpose.xlu0.b32.start [1/4] (short) (narrow) (!%p216_p12), %v265_v16, 32  ;;  %s1881_s12 = sshll.u32 (!%p216_p12), %s2275_s11, 7  ;;  %402 = vmatprep.mubr.f32.mxu0 (!%p216_p12), %v2160_v17  ;;  %v268_v44 = vld [vmem:[%s2574_s1 + $0x18] sm:$0xff] (!%p216_p12)  ;;  %v2316_v45 = vld [vmem:[%s2575_s2] sm:$0xff] (!%p216_p12)  ;;  %v2325_v48 = vld [vmem:[%s2575_s2 + $0x8] sm:$0xff] (!%p216_p12) }
  0x26   : > { %491 = vmatprep.mubr.f32.mxu1 (!%p216_p12), %v2160_v17  ;;  %s224_s15 = scalar_lea.vmem (!%p216_p12), [#allocation3], %s1881_s12  ;;  %2091 = vset.pattern.permute.xlu1 (!%p216_p12), %v2161_v46  ;;  %v532_v47 = vld [vmem:[%s2574_s1 + $0x20] sm:$0xff] (!%p216_p12)  ;;  %v533_v49 = vld [vmem:[%s2574_s1 + $0x28] sm:$0xff] (!%p216_p12)  ;;  %v2334_v50 = vld [vmem:[%s2575_s2 + $0x10] sm:$0xff] (!%p216_p12)  ;;  %vm325_vm0 = vcmask (!%p216_p12), 261120   ;;  %v2162_v59 = vmov (!%p216_p12), 1  }
  0x27   : > { %v250_v19 = vld [vmem:[%s224_s15 + $0x8] sm:$0xff] (!%p216_p12)  ;;  %v252_v21 = vld [vmem:[%s224_s15 + $0x18] sm:$0xff] (!%p216_p12)  ;;  %v249_v25 = vld [vmem:[%s224_s15] sm:$0xff] (!%p216_p12)  ;;  %275 = vperm.xlu1 (!%p216_p12), %2091, %v2316_v45   ;;  %vm1104_vm1 = vcmask (!%p216_p12), 523264   ;;  %s2165_s21 = smov (!%p216_p12), 123   ;;  %s1569_s23 = sld [smem:[#allocation2]] (!%p216_p12) }
  0x28   : > { %v254_v20 = vld [vmem:[%s224_s15 + $0x28] sm:$0xff] (!%p216_p12)  ;;  %v256_v24 = vld [vmem:[%s224_s15 + $0x38] sm:$0xff] (!%p216_p12)  ;;  %v253_v26 = vld [vmem:[%s224_s15 + $0x20] sm:$0xff] (!%p216_p12)  ;;  %s1882_s24 = sshll.u32 (!%p216_p12), %s2275_s11, 2  ;;  %s1931_s28 = sshll.u32 (!%p216_p12), %s1873_s3, 6 }
  0x29   : > { %v2286_v23 = vpack.c.bf16 (!%p216_p12), %v254_v20, %v250_v19  ;;  %294 = vxpose.xlu0.b32.cont [2/4] (short) (narrow) (!%p216_p12), %v266_v18, 32  ;;  %v2288_v27 = vpack.c.bf16 (!%p216_p12), %v256_v24, %v252_v21  ;;  %v2290_v28 = vpack.c.bf16 (!%p216_p12), %v253_v26, %v249_v25  ;;  %v251_v29 = vld [vmem:[%s224_s15 + $0x10] sm:$0xff] (!%p216_p12)  ;;  %v258_v31 = vld [vmem:[%s224_s15 + $0x48] sm:$0xff] (!%p216_p12)  ;;  %v260_v34 = vld [vmem:[%s224_s15 + $0x58] sm:$0xff] (!%p216_p12)  ;;  %s246_s29 = scalar_lea.vmem (!%p216_p12), [#allocation4], %s1882_s24  ;;  %s2529_s7 = scalar_lea.hbm (!%p216_p12), %s2577_s4, %s1931_s28 }
  0x2a   : > { %v255_v30 = vld [vmem:[%s224_s15 + $0x30] sm:$0xff] (!%p216_p12)  ;;  %v262_v33 = vld [vmem:[%s224_s15 + $0x68] sm:$0xff] (!%p216_p12)  ;;  %v264_v35 = vld [vmem:[%s224_s15 + $0x78] sm:$0xff] (!%p216_p12)  ;;  %s1809_s30 = sshll.u32 (!%p216_p12), %s246_s29, 4  ;;  %s1795_s8 = scalar_lea.sflag (!%p216_p12), [#allocation5], %s2275_s11  ;;  %s2531_s30 = int_to_ptr.vmem [resolvable:$true] %s1809_s30 }
  0x2b   : > { %1933 = vmatprep.subr.bf16.mxu0 (!%p216_p12), %v2286_v23  ;;  %v2293_v32 = vpack.c.bf16 (!%p216_p12), %v255_v30, %v251_v29  ;;  %1941 = vmatprep.subr.bf16.mxu1 (!%p216_p12), %v2288_v27  ;;  %v2297_v36 = vpack.c.bf16 (!%p216_p12), %v262_v33, %v258_v31  ;;  %v2299_v37 = vpack.c.bf16 (!%p216_p12), %v264_v35, %v260_v34  ;;  %v257_v38 = vld [vmem:[%s224_s15 + $0x40] sm:$0xff] (!%p216_p12)  ;;  %v259_v40 = vld [vmem:[%s224_s15 + $0x50] sm:$0xff] (!%p216_p12)  ;;  %v2343_v52 = vld [vmem:[%s2575_s2 + $0x18] sm:$0xff] (!%p216_p12)  ;;  %s2096_s9 = scalar_lea.vmem (!%p216_p12), %s2531_s30, 64  ;;  %s2168_s3 = smov (!%p216_p12), [#allocation4]  }
  0x2c   : > { %1935 = vmatpush1.bf16.msra.mxu0 %v2290_v28  ;;  %v261_v39 = vld [vmem:[%s224_s15 + $0x60] sm:$0xff]  ;;  %v263_v42 = vld [vmem:[%s224_s15 + $0x70] sm:$0xff]  ;;  %280 = vperm.xlu1 %2091, %v2325_v48   ;;  %v535_v53 = vld [vmem:[%s2574_s1 + $0x38] sm:$0xff]  ;;  %p2097_p13 = scmp.ne.s32.totalorder %s2531_s30, %s2096_s9  ;;  %s2100_s10 = sshll.u32 %s2168_s3, 4  ;;  %s2101_s10 = int_to_ptr.vmem [resolvable:$false] %s2100_s10 }
  0x2d   : > { %1943 = vmatpush1.bf16.msra.mxu1 %v2293_v32  ;;  %v2302_v41 = vpack.c.bf16 %v261_v39, %v257_v38  ;;  %295 = vxpose.xlu0.b32.cont [3/4] (short) (narrow) %v267_v22, 32  ;;  %v2305_v43 = vpack.c.bf16 %v263_v42, %v259_v40  ;;  %v534_v51 = vld [vmem:[%s2574_s1 + $0x30] sm:$0xff]  ;;  %v790_v58 = vld [vmem:[%s2574_s1 + $0x40] sm:$0xff]  ;;  %v791_v60 = vld [vmem:[%s2574_s1 + $0x48] sm:$0xff]  ;;  %s2102_s12 = scalar_lea.vmem %s2101_s10, 128  ;;  %p2103_p2 = scmp.lt.s32.totalorder %s2531_s30, %s2101_s10 }
  0x2e   : > { %1937 = vmatprep.subr.bf16.mxu0 %v2297_v36  ;;  %1945 = vmatprep.subr.bf16.mxu1 %v2299_v37  ;;  %v792_v61 = vld [vmem:[%s2574_s1 + $0x50] sm:$0xff]  ;;  %v793_v62 = vld [vmem:[%s2574_s1 + $0x58] sm:$0xff]  ;;  %p2098_p0 = pnand %p2097_p13, %p2235_p6  ;;  %p2104_p3 = scmp.lt.s32.totalorder %s2102_s12, %s2096_s9 }
  0x30   : > { %1939 = vmatpush1.bf16.msra.mxu0 %v2302_v41  ;;  %285 = vperm.xlu1 %2091, %v2334_v50   ;;  %p2099_p1 = pneg %p2098_p0  ;;  %p2105_p4 = por %p2104_p3, %p2103_p2 }
  0x31   : > { %1947 = vmatpush1.bf16.msra.mxu1 %v2305_v43  ;;  %296 = vxpose.xlu0.b32.end [4/4] (short) (narrow) %v268_v44, 32 }
  0x32   : > { %p2106_p5 = pnand %p2105_p4, %p2099_p1 }
  0x34   : > { %290 = vperm.xlu1 %2091, %v2343_v52  }
  0x35   : > { %552 = vxpose.xlu0.b32.start [1/4] (short) (narrow) %v532_v47, 32 }
  0x38   : > { %2092 = vset.pattern.permute.xlu1 %v2162_v59 }
  0x39   : > { %553 = vxpose.xlu0.b32.cont [2/4] (short) (narrow) %v533_v49, 32  ;;  %537 = vperm.xlu1 %2092, %v2316_v45  }
  0x3d   : > { %554 = vxpose.xlu0.b32.cont [3/4] (short) (narrow) %v534_v51, 32  ;;  %541 = vperm.xlu1 %2092, %v2325_v48  }
  0x41   : > { %555 = vxpose.xlu0.b32.end [4/4] (short) (narrow) %v535_v53, 32  ;;  %545 = vperm.xlu1 %2092, %v2334_v50  }
  0x45   : > { %810 = vxpose.xlu0.b32.start [1/4] (short) (narrow) %v790_v58, 32  ;;  %549 = vperm.xlu1 %2092, %v2343_v52  }
  0x49   : > { %811 = vxpose.xlu0.b32.cont [2/4] (short) (narrow) %v791_v60, 32 }
  0x4d   : > { %812 = vxpose.xlu0.b32.cont [3/4] (short) (narrow) %v792_v61, 32 }
  0x51   : > { %813 = vxpose.xlu0.b32.end [4/4] (short) (narrow) %v793_v62, 32 }
  0xa5   : > { %v309_v54 = vpop.trf.xlu0 }
  0xa6   : > { %1883 = vmatmul.mubr.msk.f32.vlgmr.msra.gmra.mrb[0].mxu0 %vm325_vm0, %v309_v54  ;;  %1887 = vmatmul.mubr.msk.f32.vlgmr.msra.gmra.mrb[0].mxu1 %vm325_vm0, %v309_v54  ;;  %v276_v63 = vpop.permute.xlu1 %275 }
  0xa7   : > { %408 = vmatprep.mubr.f32.mxu0 %v2160_v17  ;;  %497 = vmatprep.mubr.f32.mxu1 %v2160_v17 }
  0xa9   : > { %v310_v55 = vpop.trf.xlu0 }
  0xaa   : > { %1884 = vmatmul.mubr.msk.f32.gmra.mrb[2].mxu0 %vm325_vm0, %v310_v55  ;;  %1888 = vmatmul.mubr.msk.f32.gmra.mrb[2].mxu1 %vm325_vm0, %v310_v55 }
  0xab   : > { %414 = vmatprep.mubr.f32.mxu0 %v2160_v17  ;;  %503 = vmatprep.mubr.f32.mxu1 %v2160_v17  ;;  %v281_v0 = vpop.permute.xlu1 %280 }
  0xad   : > { %v311_v56 = vpop.trf.xlu0 }
  0xae   : > { %1885 = vmatmul.mubr.msk.f32.gmra.mrb[4].mxu0 %vm325_vm0, %v311_v56  ;;  %1889 = vmatmul.mubr.msk.f32.gmra.mrb[4].mxu1 %vm325_vm0, %v311_v56 }
  0xaf   : > { %420 = vmatprep.mubr.f32.mxu0 %v2160_v17  ;;  %509 = vmatprep.mubr.f32.mxu1 %v2160_v17  ;;  %v286_v5 = vpop.permute.xlu1 %285 }
  0xb1   : > { %v312_v57 = vpop.trf.xlu0 }
  0xb2   : > { %1886 = vmatmul.mubr.msk.f32.gmra.mrb[6].mxu0 %vm325_vm0, %v312_v57  ;;  %1890 = vmatmul.mubr.msk.f32.gmra.mrb[6].mxu1 %vm325_vm0, %v312_v57 }
  0xb3   : > { %660 = vmatprep.mubr.f32.mxu0 %v2160_v17  ;;  %749 = vmatprep.mubr.f32.mxu1 %v2160_v17  ;;  %v291_v42 = vpop.permute.xlu1 %290 }
 0x179   : > { %v404_v1 = vpop.f32.mrb[0].mxu0  ;;  %v493_v2 = vpop.f32.mrb[0].mxu1 }
 0x17a   : > { %v406_v3 = vpop.f32.mrb[1].mxu0  ;;  %v495_v4 = vpop.f32.mrb[1].mxu1  ;;  %v405_v6 = vadd.f32 %v404_v1, %v276_v63  ;;  %v494_v7 = vadd.f32 %v493_v2, %v276_v63 }
 0x17b   : > { %v407_v8 = vadd.f32 %v406_v3, %v276_v63  ;;  %v496_v9 = vadd.f32 %v495_v4, %v276_v63 }
 0x17c   : > { %v516_v19 = vmax.f32 %v405_v6, 0.0  ;;  %v518_v20 = vmax.f32 %v494_v7, 0.0 }
 0x17d   : > { %v410_v10 = vpop.f32.mrb[2].mxu0  ;;  %v499_v11 = vpop.f32.mrb[2].mxu1  ;;  %v517_v24 = vmax.f32 %v407_v8, 0.0  ;;  %v519_v25 = vmax.f32 %v496_v9, 0.0 }
 0x17e   : > { %v411_v12 = vadd.f32 %v410_v10, %v281_v0  ;;  %v500_v13 = vadd.f32 %v499_v11, %v281_v0  ;;  %v412_v14 = vpop.f32.mrb[3].mxu0  ;;  %v501_v15 = vpop.f32.mrb[3].mxu1 }
 0x17f   : > { %v413_v16 = vadd.f32 %v412_v14, %v281_v0  ;;  %v502_v18 = vadd.f32 %v501_v15, %v281_v0  ;;  %v568_v0 = vpop.trf.xlu0  ;;  %v1049_v14 = vld [vmem:[%s2574_s1 + $0x68] sm:$0xff]  ;;  %v1050_v15 = vld [vmem:[%s2574_s1 + $0x70] sm:$0xff] }
 0x180   : > { %v520_v21 = vmax.f32 %v411_v12, 0.0  ;;  %v522_v22 = vmax.f32 %v500_v13, 0.0  ;;  %v1048_v12 = vld [vmem:[%s2574_s1 + $0x60] sm:$0xff]  ;;  %v2163_v13 = vmov 2  }
 0x181   : > { %v521_v26 = vmax.f32 %v413_v16, 0.0  ;;  %v523_v29 = vmax.f32 %v502_v18, 0.0  ;;  %v416_v30 = vpop.f32.mrb[4].mxu0  ;;  %v505_v31 = vpop.f32.mrb[4].mxu1  ;;  %2093 = vset.pattern.permute.xlu1 %v2163_v13  ;;  %1072 = vxpose.xlu0.b32.start [1/8] (short) (narrow) %v1048_v12, 32  ;;  %v1051_v16 = vld [vmem:[%s2574_s1 + $0x78] sm:$0xff] }
 0x182   : > { %v1950_v33 = vpack.c.bf16 %v520_v21, %v516_v19  ;;  %v1958_v34 = vpack.c.bf16 %v522_v22, %v518_v20  ;;  %v418_v35 = vpop.f32.mrb[5].mxu0  ;;  %v507_v38 = vpop.f32.mrb[5].mxu1  ;;  %v417_v44 = vadd.f32 %v416_v30, %v286_v5  ;;  %v506_v46 = vadd.f32 %v505_v31, %v286_v5  ;;  %795 = vperm.xlu1 %2093, %v2316_v45   ;;  %v1052_v18 = vld [vmem:[%s2574_s1 + $0x80] sm:$0xff]  ;;  %v1053_v19 = vld [vmem:[%s2574_s1 + $0x88] sm:$0xff]  ;;  %v1054_v20 = vld [vmem:[%s2574_s1 + $0x90] sm:$0xff] }
 0x183   : > { %v1948_v39 = vpack.c.bf16 %v521_v26, %v517_v24  ;;  %v1956_v40 = vpack.c.bf16 %v523_v29, %v519_v25  ;;  %v419_v47 = vadd.f32 %v418_v35, %v286_v5  ;;  %v508_v49 = vadd.f32 %v507_v38, %v286_v5  ;;  %v569_v9 = vpop.trf.xlu0  ;;  %v1055_v21 = vld [vmem:[%s2574_s1 + $0x98] sm:$0xff]  ;;  %v538_v22 = vpop.permute.xlu1 %537 }
 0x184   : > { %v524_v60 = vmax.f32 %v417_v44, 0.0  ;;  %v526_v61 = vmax.f32 %v506_v46, 0.0 }
 0x185   : > { %v422_v51 = vpop.f32.mrb[6].mxu0  ;;  %v511_v53 = vpop.f32.mrb[6].mxu1  ;;  %1949 = vmatprep.subr.bf16.mxu0 %v1948_v39  ;;  %1957 = vmatprep.subr.bf16.mxu1 %v1956_v40  ;;  %v525_v1 = vmax.f32 %v419_v47, 0.0  ;;  %v527_v2 = vmax.f32 %v508_v49, 0.0 }
 0x186   : > { %v423_v54 = vadd.f32 %v422_v51, %v291_v42  ;;  %v512_v55 = vadd.f32 %v511_v53, %v291_v42  ;;  %v424_v56 = vpop.f32.mrb[7].mxu0  ;;  %v513_v57 = vpop.f32.mrb[7].mxu1  ;;  %1951 = vmatpush1.bf16.msra.mxu0 %v1950_v33  ;;  %1959 = vmatpush1.bf16.msra.mxu1 %v1958_v34 }
 0x187   : > { %v425_v58 = vadd.f32 %v424_v56, %v291_v42  ;;  %v514_v59 = vadd.f32 %v513_v57, %v291_v42  ;;  %v570_v10 = vpop.trf.xlu0  ;;  %1073 = vxpose.xlu0.b32.cont [2/8] (short) (narrow) %v1049_v14, 32  ;;  %799 = vperm.xlu1 %2093, %v2325_v48   ;;  %v542_v24 = vpop.permute.xlu1 %541 }
 0x188   : > { %v528_v62 = vmax.f32 %v423_v54, 0.0  ;;  %v530_v63 = vmax.f32 %v512_v55, 0.0 }
 0x189   : > { %v529_v3 = vmax.f32 %v425_v58, 0.0  ;;  %v531_v4 = vmax.f32 %v514_v59, 0.0 }
 0x18a   : > { %v1954_v5 = vpack.c.bf16 %v528_v62, %v524_v60  ;;  %v1962_v6 = vpack.c.bf16 %v530_v63, %v526_v61 }
 0x18b   : > { %v1952_v7 = vpack.c.bf16 %v529_v3, %v525_v1  ;;  %v1960_v8 = vpack.c.bf16 %v531_v4, %v527_v2  ;;  %v571_v11 = vpop.trf.xlu0  ;;  %1074 = vxpose.xlu0.b32.cont [3/8] (short) (narrow) %v1050_v15, 32  ;;  %803 = vperm.xlu1 %2093, %v2334_v50   ;;  %v546_v31 = vpop.permute.xlu1 %545 }
 0x18d   : > { %1953 = vmatprep.subr.bf16.mxu0 %v1952_v7  ;;  %1961 = vmatprep.subr.bf16.mxu1 %v1960_v8 }
 0x18e   : > { %1955 = vmatpush1.bf16.msra.mxu0 %v1954_v5  ;;  %1963 = vmatpush1.bf16.msra.mxu1 %v1962_v6 }
 0x18f   : > { %1075 = vxpose.xlu0.b32.cont [4/8] (short) (narrow) %v1051_v16, 32  ;;  %807 = vperm.xlu1 %2093, %v2343_v52   ;;  %v550_v5 = vpop.permute.xlu1 %549 }
 0x191   : > { %1891 = vmatmul.mubr.msk.f32.vlgmr.msra.gmra.mrb[8].mxu0 %vm325_vm0, %v568_v0  ;;  %1895 = vmatmul.mubr.msk.f32.vlgmr.msra.gmra.mrb[8].mxu1 %vm325_vm0, %v568_v0 }
 0x192   : > { %666 = vmatprep.mubr.f32.mxu0 %v2160_v17  ;;  %755 = vmatprep.mubr.f32.mxu1 %v2160_v17 }
 0x193   : > { %1076 = vxpose.xlu0.b32.cont [5/8] (short) (narrow) %v1052_v18, 32 }
 0x195   : > { %1892 = vmatmul.mubr.msk.f32.gmra.mrb[10].mxu0 %vm325_vm0, %v569_v9  ;;  %1896 = vmatmul.mubr.msk.f32.gmra.mrb[10].mxu1 %vm325_vm0, %v569_v9 }
 0x196   : > { %672 = vmatprep.mubr.f32.mxu0 %v2160_v17  ;;  %761 = vmatprep.mubr.f32.mxu1 %v2160_v17 }
 0x197   : > { %1077 = vxpose.xlu0.b32.cont [6/8] (short) (narrow) %v1053_v19, 32 }
 0x199   : > { %1893 = vmatmul.mubr.msk.f32.gmra.mrb[12].mxu0 %vm325_vm0, %v570_v10  ;;  %1897 = vmatmul.mubr.msk.f32.gmra.mrb[12].mxu1 %vm325_vm0, %v570_v10 }
 0x19a   : > { %678 = vmatprep.mubr.f32.mxu0 %v2160_v17  ;;  %767 = vmatprep.mubr.f32.mxu1 %v2160_v17 }
 0x19b   : > { %1078 = vxpose.xlu0.b32.cont [7/8] (short) (narrow) %v1054_v20, 32 }
 0x19d   : > { %1894 = vmatmul.mubr.msk.f32.gmra.mrb[14].mxu0 %vm325_vm0, %v571_v11  ;;  %1898 = vmatmul.mubr.msk.f32.gmra.mrb[14].mxu1 %vm325_vm0, %v571_v11 }
 0x19e   : > { %918 = vmatprep.mubr.f32.mxu0 %v2160_v17  ;;  %1007 = vmatprep.mubr.f32.mxu1 %v2160_v17 }
 0x19f   : > { %1079 = vxpose.xlu0.b32.end [8/8] (short) (narrow) %v1055_v21, 32 }
 0x1c8   : > { %1571 = vrot.lane.b32.xlu0 %v2316_v45, %s2165_s21 }
 0x1cc   : > { %1575 = vrot.lane.b32.xlu0 %v2334_v50, %s2165_s21 }
 0x1d0   : > { %1577 = vrot.lane.b32.xlu0 %v2343_v52, %s2165_s21 }
 0x264   : > { %v662_v25 = vpop.f32.mrb[8].mxu0  ;;  %v751_v26 = vpop.f32.mrb[8].mxu1 }
 0x265   : > { %v664_v29 = vpop.f32.mrb[9].mxu0  ;;  %v753_v30 = vpop.f32.mrb[9].mxu1  ;;  %v663_v33 = vadd.f32 %v662_v25, %v538_v22  ;;  %v752_v34 = vadd.f32 %v751_v26, %v538_v22 }
 0x266   : > { %v665_v35 = vadd.f32 %v664_v29, %v538_v22  ;;  %v754_v38 = vadd.f32 %v753_v30, %v538_v22 }
 0x267   : > { %v774_v53 = vmax.f32 %v663_v33, 0.0  ;;  %v776_v54 = vmax.f32 %v752_v34, 0.0 }
 0x268   : > { %v668_v39 = vpop.f32.mrb[10].mxu0  ;;  %v757_v40 = vpop.f32.mrb[10].mxu1  ;;  %v775_v57 = vmax.f32 %v665_v35, 0.0  ;;  %v777_v58 = vmax.f32 %v754_v38, 0.0 }
 0x269   : > { %v669_v42 = vadd.f32 %v668_v39, %v542_v24  ;;  %v758_v44 = vadd.f32 %v757_v40, %v542_v24  ;;  %v670_v46 = vpop.f32.mrb[11].mxu0  ;;  %v759_v47 = vpop.f32.mrb[11].mxu1 }
 0x26a   : > { %v671_v49 = vadd.f32 %v670_v46, %v542_v24  ;;  %v760_v51 = vadd.f32 %v759_v47, %v542_v24  ;;  %v826_v24 = vpop.trf.xlu0 }
 0x26b   : > { %v778_v55 = vmax.f32 %v669_v42, 0.0  ;;  %v780_v56 = vmax.f32 %v758_v44, 0.0 }
 0x26c   : > { %v779_v59 = vmax.f32 %v671_v49, 0.0  ;;  %v781_v60 = vmax.f32 %v760_v51, 0.0  ;;  %v674_v61 = vpop.f32.mrb[12].mxu0  ;;  %v763_v62 = vpop.f32.mrb[12].mxu1 }
 0x26d   : > { %v1966_v63 = vpack.c.bf16 %v778_v55, %v774_v53  ;;  %v1974_v0 = vpack.c.bf16 %v780_v56, %v776_v54  ;;  %v676_v1 = vpop.f32.mrb[13].mxu0  ;;  %v765_v2 = vpop.f32.mrb[13].mxu1  ;;  %v675_v6 = vadd.f32 %v674_v61, %v546_v31  ;;  %v764_v7 = vadd.f32 %v763_v62, %v546_v31 }
 0x26e   : > { %v1964_v3 = vpack.c.bf16 %v779_v59, %v775_v57  ;;  %v1972_v4 = vpack.c.bf16 %v781_v60, %v777_v58  ;;  %v677_v8 = vadd.f32 %v676_v1, %v546_v31  ;;  %v766_v9 = vadd.f32 %v765_v2, %v546_v31  ;;  %v827_v38 = vpop.trf.xlu0 }
 0x26f   : > { %v782_v19 = vmax.f32 %v675_v6, 0.0  ;;  %v784_v20 = vmax.f32 %v764_v7, 0.0 }
 0x270   : > { %v680_v10 = vpop.f32.mrb[14].mxu0  ;;  %v769_v11 = vpop.f32.mrb[14].mxu1  ;;  %1965 = vmatprep.subr.bf16.mxu0 %v1964_v3  ;;  %1973 = vmatprep.subr.bf16.mxu1 %v1972_v4  ;;  %v783_v25 = vmax.f32 %v677_v8, 0.0  ;;  %v785_v26 = vmax.f32 %v766_v9, 0.0 }
 0x271   : > { %v681_v12 = vadd.f32 %v680_v10, %v550_v5  ;;  %v770_v13 = vadd.f32 %v769_v11, %v550_v5  ;;  %v682_v14 = vpop.f32.mrb[15].mxu0  ;;  %v771_v15 = vpop.f32.mrb[15].mxu1  ;;  %1967 = vmatpush1.bf16.msra.mxu0 %v1966_v63  ;;  %1975 = vmatpush1.bf16.msra.mxu1 %v1974_v0 }
 0x272   : > { %v683_v16 = vadd.f32 %v682_v14, %v550_v5  ;;  %v772_v18 = vadd.f32 %v771_v15, %v550_v5  ;;  %v828_v39 = vpop.trf.xlu0 }
 0x273   : > { %v786_v21 = vmax.f32 %v681_v12, 0.0  ;;  %v788_v22 = vmax.f32 %v770_v13, 0.0 }
 0x274   : > { %v787_v29 = vmax.f32 %v683_v16, 0.0  ;;  %v789_v30 = vmax.f32 %v772_v18, 0.0 }
 0x275   : > { %v1970_v31 = vpack.c.bf16 %v786_v21, %v782_v19  ;;  %v1978_v33 = vpack.c.bf16 %v788_v22, %v784_v20 }
 0x276   : > { %v1968_v34 = vpack.c.bf16 %v787_v29, %v783_v25  ;;  %v1976_v35 = vpack.c.bf16 %v789_v30, %v785_v26 }
 0x278   : > { %1969 = vmatprep.subr.bf16.mxu0 %v1968_v34  ;;  %1977 = vmatprep.subr.bf16.mxu1 %v1976_v35 }
 0x279   : > { %1971 = vmatpush1.bf16.msra.mxu0 %v1970_v31  ;;  %1979 = vmatpush1.bf16.msra.mxu1 %v1978_v33 }
 0x27a   : > { %1981 = vmatprep.subr.bf16.mxu0 %v2286_v23  ;;  %1997 = vmatprep.subr.bf16.mxu1 %v2288_v27  ;;  %v829_v23 = vpop.trf.xlu0  ;;  %v2164_v27 = vmov 3  }
 0x27b   : > { %2094 = vset.pattern.permute.xlu1 %v2164_v27 }
 0x27c   : > { %1899 = vmatmul.mubr.msk.f32.vlgmr.msra.gmra.mrb[16].mxu0 %vm325_vm0, %v826_v24  ;;  %1903 = vmatmul.mubr.msk.f32.vlgmr.msra.gmra.mrb[16].mxu1 %vm325_vm0, %v826_v24 }
 0x27d   : > { %924 = vmatprep.mubr.f32.mxu0 %v2160_v17  ;;  %1013 = vmatprep.mubr.f32.mxu1 %v2160_v17 }
 0x27e   : > { %1983 = vmatpush1.bf16.msra.mxu0 %v2290_v28  ;;  %1999 = vmatpush1.bf16.msra.mxu1 %v2293_v32  ;;  %v1311_v28 = vld [vmem:[%s2574_s1 + $0xa0] sm:$0xff]  ;;  %v1312_v32 = vld [vmem:[%s2574_s1 + $0xa8] sm:$0xff] }
 0x27f   : > { %1985 = vmatprep.subr.bf16.mxu0 %v2297_v36  ;;  %2001 = vmatprep.subr.bf16.mxu1 %v2299_v37  ;;  %v1313_v36 = vld [vmem:[%s2574_s1 + $0xb0] sm:$0xff]  ;;  %v1314_v37 = vld [vmem:[%s2574_s1 + $0xb8] sm:$0xff] }
 0x280   : > { %1900 = vmatmul.mubr.msk.f32.gmra.mrb[18].mxu0 %vm325_vm0, %v827_v38  ;;  %1904 = vmatmul.mubr.msk.f32.gmra.mrb[18].mxu1 %vm325_vm0, %v827_v38 }
 0x281   : > { %930 = vmatprep.mubr.f32.mxu0 %v2160_v17  ;;  %1019 = vmatprep.mubr.f32.mxu1 %v2160_v17 }
 0x282   : > { %1987 = vmatpush1.bf16.msra.mxu0 %v2302_v41  ;;  %2003 = vmatpush1.bf16.msra.mxu1 %v2305_v43  ;;  %v796_v41 = vpop.permute.xlu1 %795 }
 0x283   : > { %1057 = vperm.xlu1 %2094, %v2316_v45  }
 0x284   : > { %1901 = vmatmul.mubr.msk.f32.gmra.mrb[20].mxu0 %vm325_vm0, %v828_v39  ;;  %1905 = vmatmul.mubr.msk.f32.gmra.mrb[20].mxu1 %vm325_vm0, %v828_v39  ;;  %v1088_v39 = vpop.trf.xlu0 }
 0x285   : > { %936 = vmatprep.mubr.f32.mxu0 %v2160_v17  ;;  %1025 = vmatprep.mubr.f32.mxu1 %v2160_v17 }
 0x286   : > { %v800_v43 = vpop.permute.xlu1 %799 }
 0x287   : > { %1061 = vperm.xlu1 %2094, %v2325_v48  }
 0x288   : > { %1902 = vmatmul.mubr.msk.f32.gmra.mrb[22].mxu0 %vm325_vm0, %v829_v23  ;;  %1906 = vmatmul.mubr.msk.f32.gmra.mrb[22].mxu1 %vm325_vm0, %v829_v23 }
 0x289   : > { %1181 = vmatprep.mubr.f32.mxu0 %v2160_v17  ;;  %1270 = vmatprep.mubr.f32.mxu1 %v2160_v17 }
 0x28a   : > { %v804_v47 = vpop.permute.xlu1 %803 }
 0x28b   : > { %1065 = vperm.xlu1 %2094, %v2334_v50  }
 0x28e   : > { %v808_v15 = vpop.permute.xlu1 %807 }
 0x28f   : > { %1069 = vperm.xlu1 %2094, %v2343_v52  }
 0x2b8   : > { %1331 = vxpose.xlu1.b32.start [1/4] (short) (narrow) %v1311_v28, 32 }
 0x2bc   : > { %1332 = vxpose.xlu1.b32.cont [2/4] (short) (narrow) %v1312_v32, 32 }
 0x2c0   : > { %1333 = vxpose.xlu1.b32.cont [3/4] (short) (narrow) %v1313_v36, 32 }
 0x2c4   : > { %1334 = vxpose.xlu1.b32.end [4/4] (short) (narrow) %v1314_v37, 32 }
 0x2e2   : > { %1573 = vrot.lane.b32.xlu1 %v2325_v48, %s2165_s21 }
 0x34f   : > { %v920_v40 = vpop.f32.mrb[16].mxu0  ;;  %v1009_v42 = vpop.f32.mrb[16].mxu1 }
 0x350   : > { %v922_v44 = vpop.f32.mrb[17].mxu0  ;;  %v1011_v46 = vpop.f32.mrb[17].mxu1  ;;  %v921_v49 = vadd.f32 %v920_v40, %v796_v41  ;;  %v1010_v51 = vadd.f32 %v1009_v42, %v796_v41 }
 0x351   : > { %v923_v53 = vadd.f32 %v922_v44, %v796_v41  ;;  %v1012_v54 = vadd.f32 %v1011_v46, %v796_v41  ;;  %v1089_v40 = vpop.trf.xlu0  ;;  %v2166_v46 = vmov 4  }
 0x352   : > { %v1032_v63 = vmax.f32 %v921_v49, 0.0  ;;  %v1034_v0 = vmax.f32 %v1010_v51, 0.0  ;;  %2095 = vset.pattern.permute.xlu0 %v2166_v46 }
 0x353   : > { %v926_v55 = vpop.f32.mrb[18].mxu0  ;;  %v1015_v56 = vpop.f32.mrb[18].mxu1  ;;  %v1033_v3 = vmax.f32 %v923_v53, 0.0  ;;  %v1035_v4 = vmax.f32 %v1012_v54, 0.0  ;;  %1316 = vperm.xlu0 %2095, %v2316_v45  }
 0x354   : > { %v927_v57 = vadd.f32 %v926_v55, %v800_v43  ;;  %v1016_v58 = vadd.f32 %v1015_v56, %v800_v43  ;;  %v928_v59 = vpop.f32.mrb[19].mxu0  ;;  %v1017_v60 = vpop.f32.mrb[19].mxu1 }
 0x355   : > { %v929_v61 = vadd.f32 %v928_v59, %v800_v43  ;;  %v1018_v62 = vadd.f32 %v1017_v60, %v800_v43  ;;  %v1090_v42 = vpop.trf.xlu0 }
 0x356   : > { %v1036_v1 = vmax.f32 %v927_v57, 0.0  ;;  %v1038_v2 = vmax.f32 %v1016_v58, 0.0 }
 0x357   : > { %v1037_v5 = vmax.f32 %v929_v61, 0.0  ;;  %v1039_v6 = vmax.f32 %v1018_v62, 0.0  ;;  %v932_v7 = vpop.f32.mrb[20].mxu0  ;;  %v1021_v8 = vpop.f32.mrb[20].mxu1  ;;  %1320 = vperm.xlu0 %2095, %v2325_v48  }
 0x358   : > { %v1990_v9 = vpack.c.bf16 %v1036_v1, %v1032_v63  ;;  %v2006_v10 = vpack.c.bf16 %v1038_v2, %v1034_v0  ;;  %v934_v11 = vpop.f32.mrb[21].mxu0  ;;  %v1023_v12 = vpop.f32.mrb[21].mxu1  ;;  %v933_v16 = vadd.f32 %v932_v7, %v804_v47  ;;  %v1022_v18 = vadd.f32 %v1021_v8, %v804_v47 }
 0x359   : > { %v1988_v13 = vpack.c.bf16 %v1037_v5, %v1033_v3  ;;  %v2004_v14 = vpack.c.bf16 %v1039_v6, %v1035_v4  ;;  %v935_v19 = vadd.f32 %v934_v11, %v804_v47  ;;  %v1024_v20 = vadd.f32 %v1023_v12, %v804_v47  ;;  %v1091_v44 = vpop.trf.xlu0  ;;  %v1058_v47 = vpop.permute.xlu1 %1057 }
 0x35a   : > { %v1040_v33 = vmax.f32 %v933_v16, 0.0  ;;  %v1042_v34 = vmax.f32 %v1022_v18, 0.0 }
 0x35b   : > { %v938_v21 = vpop.f32.mrb[22].mxu0  ;;  %v1027_v22 = vpop.f32.mrb[22].mxu1  ;;  %1989 = vmatprep.subr.bf16.mxu0 %v1988_v13  ;;  %2005 = vmatprep.subr.bf16.mxu1 %v2004_v14  ;;  %v1041_v23 = vmax.f32 %v935_v19, 0.0  ;;  %v1043_v27 = vmax.f32 %v1024_v20, 0.0 }
 0x35c   : > { %v939_v24 = vadd.f32 %v938_v21, %v808_v15  ;;  %v1028_v25 = vadd.f32 %v1027_v22, %v808_v15  ;;  %v940_v26 = vpop.f32.mrb[23].mxu0  ;;  %v1029_v29 = vpop.f32.mrb[23].mxu1  ;;  %1991 = vmatpush1.bf16.msra.mxu0 %v1990_v9  ;;  %2007 = vmatpush1.bf16.msra.mxu1 %v2006_v10 }
 0x35d   : > { %v941_v30 = vadd.f32 %v940_v26, %v808_v15  ;;  %v1030_v31 = vadd.f32 %v1029_v29, %v808_v15  ;;  %1324 = vperm.xlu0 %2095, %v2334_v50   ;;  %v1062_v49 = vpop.permute.xlu1 %1061  ;;  %v1572_v60 = vpop.permute.xlu0 %1571 }
 0x35e   : > { %v1044_v35 = vmax.f32 %v939_v24, 0.0  ;;  %v1046_v38 = vmax.f32 %v1028_v25, 0.0  ;;  %1583 = vxpose.xlu1.b32.start [1/4] (short) (narrow) %v1572_v60, 8 }
 0x35f   : > { %v1045_v28 = vmax.f32 %v941_v30, 0.0  ;;  %v1047_v32 = vmax.f32 %v1030_v31, 0.0 }
 0x360   : > { %v1994_v36 = vpack.c.bf16 %v1044_v35, %v1040_v33  ;;  %v2010_v37 = vpack.c.bf16 %v1046_v38, %v1042_v34 }
 0x361   : > { %v1992_v41 = vpack.c.bf16 %v1045_v28, %v1041_v23  ;;  %v2008_v43 = vpack.c.bf16 %v1047_v32, %v1043_v27  ;;  %1328 = vperm.xlu0 %2095, %v2343_v52   ;;  %v1066_v51 = vpop.permute.xlu1 %1065  ;;  %v1576_v8 = vpop.permute.xlu0 %1575 }
 0x363   : > { %1993 = vmatprep.subr.bf16.mxu0 %v1992_v41  ;;  %2009 = vmatprep.subr.bf16.mxu1 %v2008_v43 }
 0x364   : > { %1995 = vmatpush1.bf16.msra.mxu0 %v1994_v36  ;;  %2011 = vmatpush1.bf16.msra.mxu1 %v2010_v37 }
 0x365   : > { %v1070_v53 = vpop.permute.xlu1 %1069  ;;  %v1578_v31 = vpop.permute.xlu0 %1577 }
 0x367   : > { %1907 = vmatmul.mubr.msk.f32.vlgmr.msra.gmra.mrb[24].mxu0 %vm1104_vm1, %v1088_v39  ;;  %1911 = vmatmul.mubr.msk.f32.vlgmr.msra.gmra.mrb[24].mxu1 %vm1104_vm1, %v1088_v39 }
 0x368   : > { %1187 = vmatprep.mubr.f32.mxu0 %v2160_v17  ;;  %1276 = vmatprep.mubr.f32.mxu1 %v2160_v17 }
 0x369   : > { %v2489_v54 = vpop.trf.xlu1 }
 0x36b   : > { %1908 = vmatmul.mubr.msk.f32.gmra.mrb[26].mxu0 %vm1104_vm1, %v1089_v40  ;;  %1912 = vmatmul.mubr.msk.f32.gmra.mrb[26].mxu1 %vm1104_vm1, %v1089_v40 }
 0x36c   : > { %1193 = vmatprep.mubr.f32.mxu0 %v2160_v17  ;;  %1282 = vmatprep.mubr.f32.mxu1 %v2160_v17 }
 0x36d   : > { %v2491_v55 = vpop.trf.xlu1 }
 0x36f   : > { %1909 = vmatmul.mubr.msk.f32.gmra.mrb[28].mxu0 %vm1104_vm1, %v1090_v42  ;;  %1913 = vmatmul.mubr.msk.f32.gmra.mrb[28].mxu1 %vm1104_vm1, %v1090_v42 }
 0x370   : > { %1199 = vmatprep.mubr.f32.mxu0 %v2160_v17  ;;  %1288 = vmatprep.mubr.f32.mxu1 %v2160_v17 }
 0x371   : > { %v2493_v56 = vpop.trf.xlu1 }
 0x373   : > { %1910 = vmatmul.mubr.msk.f32.gmra.mrb[30].mxu0 %vm1104_vm1, %v1091_v44  ;;  %1914 = vmatmul.mubr.msk.f32.gmra.mrb[30].mxu1 %vm1104_vm1, %v1091_v44 }
 0x374   : > { %1439 = vmatprep.mubr.f32.mxu0 %v2160_v17  ;;  %1528 = vmatprep.mubr.f32.mxu1 %v2160_v17 }
 0x375   : > { %v2495_v57 = vpop.trf.xlu1 }
 0x379   : > { %v1574_v52 = vpop.permute.xlu1 %1573 }
 0x37a   : > { %1584 = vxpose.xlu1.b32.cont [2/4] (short) (narrow) %v1574_v52, 8 }
 0x37e   : > { %1585 = vxpose.xlu1.b32.cont [3/4] (short) (narrow) %v1576_v8, 8 }
 0x382   : > { %1586 = vxpose.xlu1.b32.end [4/4] (short) (narrow) %v1578_v31, 8 }
 0x43a   : > { %v1183_v58 = vpop.f32.mrb[24].mxu0  ;;  %v1272_v45 = vpop.f32.mrb[24].mxu1 }
 0x43b   : > { %v1185_v59 = vpop.f32.mrb[25].mxu0  ;;  %v1274_v48 = vpop.f32.mrb[25].mxu1  ;;  %v1184_v50 = vadd.f32 %v1183_v58, %v1058_v47  ;;  %v1273_v61 = vadd.f32 %v1272_v45, %v1058_v47 }
 0x43c   : > { %v1186_v62 = vadd.f32 %v1185_v59, %v1058_v47  ;;  %v1275_v63 = vadd.f32 %v1274_v48, %v1058_v47 }
 0x43d   : > { %v1295_v9 = vmax.f32 %v1184_v50, 0.0  ;;  %v1297_v10 = vmax.f32 %v1273_v61, 0.0 }
 0x43e   : > { %v1189_v0 = vpop.f32.mrb[26].mxu0  ;;  %v1278_v1 = vpop.f32.mrb[26].mxu1  ;;  %v1296_v13 = vmax.f32 %v1186_v62, 0.0  ;;  %v1298_v14 = vmax.f32 %v1275_v63, 0.0 }
 0x43f   : > { %v1190_v2 = vadd.f32 %v1189_v0, %v1062_v49  ;;  %v1279_v3 = vadd.f32 %v1278_v1, %v1062_v49  ;;  %v1191_v4 = vpop.f32.mrb[27].mxu0  ;;  %v1280_v5 = vpop.f32.mrb[27].mxu1 }
 0x440   : > { %v1192_v6 = vadd.f32 %v1191_v4, %v1062_v49  ;;  %v1281_v7 = vadd.f32 %v1280_v5, %v1062_v49 }
 0x441   : > { %v1299_v11 = vmax.f32 %v1190_v2, 0.0  ;;  %v1301_v12 = vmax.f32 %v1279_v3, 0.0 }
 0x442   : > { %v1300_v15 = vmax.f32 %v1192_v6, 0.0  ;;  %v1302_v16 = vmax.f32 %v1281_v7, 0.0  ;;  %v1195_v18 = vpop.f32.mrb[28].mxu0  ;;  %v1284_v19 = vpop.f32.mrb[28].mxu1 }
 0x443   : > { %v2014_v20 = vpack.c.bf16 %v1299_v11, %v1295_v9  ;;  %v2022_v21 = vpack.c.bf16 %v1301_v12, %v1297_v10  ;;  %v1197_v22 = vpop.f32.mrb[29].mxu0  ;;  %v1286_v24 = vpop.f32.mrb[29].mxu1  ;;  %v1196_v29 = vadd.f32 %v1195_v18, %v1066_v51  ;;  %v1285_v30 = vadd.f32 %v1284_v19, %v1066_v51 }
 0x444   : > { %v2012_v25 = vpack.c.bf16 %v1300_v15, %v1296_v13  ;;  %v2020_v26 = vpack.c.bf16 %v1302_v16, %v1298_v14  ;;  %v1198_v33 = vadd.f32 %v1197_v22, %v1066_v51  ;;  %v1287_v34 = vadd.f32 %v1286_v24, %v1066_v51 }
 0x445   : > { %v1303_v37 = vmax.f32 %v1196_v29, 0.0  ;;  %v1305_v41 = vmax.f32 %v1285_v30, 0.0 }
 0x446   : > { %v1201_v35 = vpop.f32.mrb[30].mxu0  ;;  %v1290_v38 = vpop.f32.mrb[30].mxu1  ;;  %2013 = vmatprep.subr.bf16.mxu0 %v2012_v25  ;;  %2021 = vmatprep.subr.bf16.mxu1 %v2020_v26  ;;  %v1304_v42 = vmax.f32 %v1198_v33, 0.0  ;;  %v1306_v44 = vmax.f32 %v1287_v34, 0.0 }
 0x447   : > { %v1202_v39 = vadd.f32 %v1201_v35, %v1070_v53  ;;  %v1291_v23 = vadd.f32 %v1290_v38, %v1070_v53  ;;  %v1203_v27 = vpop.f32.mrb[31].mxu0  ;;  %v1292_v28 = vpop.f32.mrb[31].mxu1  ;;  %2015 = vmatpush1.bf16.msra.mxu0 %v2014_v20  ;;  %2023 = vmatpush1.bf16.msra.mxu1 %v2022_v21 }
 0x448   : > { %v1204_v32 = vadd.f32 %v1203_v27, %v1070_v53  ;;  %v1293_v36 = vadd.f32 %v1292_v28, %v1070_v53  ;;  %v1317_v53 = vpop.permute.xlu0 %1316 }
 0x449   : > { %v1307_v43 = vmax.f32 %v1202_v39, 0.0  ;;  %v1309_v40 = vmax.f32 %v1291_v23, 0.0 }
 0x44a   : > { %v1308_v46 = vmax.f32 %v1204_v32, 0.0  ;;  %v1310_v47 = vmax.f32 %v1293_v36, 0.0 }
 0x44b   : > { %v2018_v49 = vpack.c.bf16 %v1307_v43, %v1303_v37  ;;  %v2026_v51 = vpack.c.bf16 %v1309_v40, %v1305_v41 }
 0x44c   : > { %v2016_v58 = vpack.c.bf16 %v1308_v46, %v1304_v42  ;;  %v2024_v45 = vpack.c.bf16 %v1310_v47, %v1306_v44 }
 0x44e   : > { %2017 = vmatprep.subr.bf16.mxu0 %v2016_v58  ;;  %2025 = vmatprep.subr.bf16.mxu1 %v2024_v45  ;;  %v1769_v45 = vlaneseq }
 0x44f   : > { %2019 = vmatpush1.bf16.msra.mxu0 %v2018_v49  ;;  %2027 = vmatpush1.bf16.msra.mxu1 %v2026_v51  ;;  %v1599_v49 = vpop.trf.xlu1  ;;  %v2167_v51 = vmov 1966171168  }
 0x450   : > { %v1767_v58 = vunpack.c.l.s4 %v2167_v51  ;;  %vm1791_vm2 = vcmp.lt.s32.totalorder %v1769_v45, 512 }
 0x452   : > { %1915 = vmatmul.mubr.msk.f32.vlgmr.msra.gmra.mrb[32].mxu0 %vm325_vm0, %v2489_v54  ;;  %1919 = vmatmul.mubr.msk.f32.vlgmr.msra.gmra.mrb[32].mxu1 %vm325_vm0, %v2489_v54  ;;  %v1321_v54 = vpop.permute.xlu0 %1320 }
 0x453   : > { %1445 = vmatprep.mubr.f32.mxu0 %v2160_v17  ;;  %1534 = vmatprep.mubr.f32.mxu1 %v2160_v17 }
 0x456   : > { %1916 = vmatmul.mubr.msk.f32.gmra.mrb[34].mxu0 %vm325_vm0, %v2491_v55  ;;  %1920 = vmatmul.mubr.msk.f32.gmra.mrb[34].mxu1 %vm325_vm0, %v2491_v55  ;;  %v1325_v60 = vpop.permute.xlu0 %1324 }
 0x457   : > { %1451 = vmatprep.mubr.f32.mxu0 %v2160_v17  ;;  %1540 = vmatprep.mubr.f32.mxu1 %v2160_v17 }
 0x45a   : > { %1917 = vmatmul.mubr.msk.f32.gmra.mrb[36].mxu0 %vm325_vm0, %v2493_v56  ;;  %1921 = vmatmul.mubr.msk.f32.gmra.mrb[36].mxu1 %vm325_vm0, %v2493_v56  ;;  %v1329_v22 = vpop.permute.xlu0 %1328 }
 0x45b   : > { %1457 = vmatprep.mubr.f32.mxu0 %v2160_v17  ;;  %1546 = vmatprep.mubr.f32.mxu1 %v2160_v17 }
 0x45e   : > { %1918 = vmatmul.mubr.msk.f32.gmra.mrb[38].mxu0 %vm325_vm0, %v2495_v57  ;;  %1922 = vmatmul.mubr.msk.f32.gmra.mrb[38].mxu1 %vm325_vm0, %v2495_v57 }
 0x45f   : > { %1682 = vmatprep.mubr.f32.mxu0 %v2160_v17  ;;  %1753 = vmatprep.mubr.f32.mxu1 %v2160_v17 }
 0x525   : > { %v1441_v55 = vpop.f32.mrb[32].mxu0  ;;  %v1530_v59 = vpop.f32.mrb[32].mxu1 }
 0x526   : > { %v1443_v48 = vpop.f32.mrb[33].mxu0  ;;  %v1532_v56 = vpop.f32.mrb[33].mxu1  ;;  %v1442_v50 = vadd.f32 %v1441_v55, %v1317_v53  ;;  %v1531_v61 = vadd.f32 %v1530_v59, %v1317_v53  ;;  %v1770_v55 = vshrl.u32 %v1769_v45, 7 }
 0x527   : > { %v1444_v52 = vadd.f32 %v1443_v48, %v1317_v53  ;;  %v1533_v62 = vadd.f32 %v1532_v56, %v1317_v53  ;;  %v1570_v53 = vstv %s1569_s23 }
 0x528   : > { %v1553_v17 = vmax.f32 %v1442_v50, 0.0  ;;  %v1555_v6 = vmax.f32 %v1531_v61, 0.0 }
 0x529   : > { %v1447_v63 = vpop.f32.mrb[34].mxu0  ;;  %v1536_v0 = vpop.f32.mrb[34].mxu1  ;;  %v1554_v9 = vmax.f32 %v1444_v52, 0.0  ;;  %v1556_v10 = vmax.f32 %v1533_v62, 0.0 }
 0x52a   : > { %v1448_v1 = vadd.f32 %v1447_v63, %v1321_v54  ;;  %v1537_v2 = vadd.f32 %v1536_v0, %v1321_v54  ;;  %v1449_v57 = vpop.f32.mrb[35].mxu0  ;;  %v1538_v3 = vpop.f32.mrb[35].mxu1 }
 0x52b   : > { %v1450_v4 = vadd.f32 %v1449_v57, %v1321_v54  ;;  %v1539_v5 = vadd.f32 %v1538_v3, %v1321_v54  ;;  %v1768_v54 = vunpack.c.0.s8 %v1767_v58 }
 0x52c   : > { %v1557_v7 = vmax.f32 %v1448_v1, 0.0  ;;  %v1559_v8 = vmax.f32 %v1537_v2, 0.0 }
 0x52d   : > { %v1558_v11 = vmax.f32 %v1450_v4, 0.0  ;;  %v1560_v12 = vmax.f32 %v1539_v5, 0.0  ;;  %v1453_v13 = vpop.f32.mrb[36].mxu0  ;;  %v1542_v14 = vpop.f32.mrb[36].mxu1  ;;  %v1771_v62 = vsub.s32 %v1768_v54, %v1770_v55 }
 0x52e   : > { %v2030_v15 = vpack.c.bf16 %v1557_v7, %v1553_v17  ;;  %v2038_v16 = vpack.c.bf16 %v1559_v8, %v1555_v6  ;;  %v1455_v18 = vpop.f32.mrb[37].mxu0  ;;  %v1544_v19 = vpop.f32.mrb[37].mxu1  ;;  %v1454_v24 = vadd.f32 %v1453_v13, %v1325_v60  ;;  %v1543_v25 = vadd.f32 %v1542_v14, %v1325_v60 }
 0x52f   : > { %v2028_v20 = vpack.c.bf16 %v1558_v11, %v1554_v9  ;;  %v2036_v21 = vpack.c.bf16 %v1560_v12, %v1556_v10  ;;  %v1456_v26 = vadd.f32 %v1455_v18, %v1325_v60  ;;  %v1545_v29 = vadd.f32 %v1544_v19, %v1325_v60 }
 0x530   : > { %v1561_v27 = vmax.f32 %v1454_v24, 0.0  ;;  %v1563_v28 = vmax.f32 %v1543_v25, 0.0 }
 0x531   : > { %v1459_v30 = vpop.f32.mrb[38].mxu0  ;;  %v1548_v31 = vpop.f32.mrb[38].mxu1  ;;  %2029 = vmatprep.subr.bf16.mxu0 %v2028_v20  ;;  %2037 = vmatprep.subr.bf16.mxu1 %v2036_v21  ;;  %v1562_v37 = vmax.f32 %v1456_v26, 0.0  ;;  %v1564_v41 = vmax.f32 %v1545_v29, 0.0 }
 0x532   : > { %v1460_v33 = vadd.f32 %v1459_v30, %v1329_v22  ;;  %v1549_v34 = vadd.f32 %v1548_v31, %v1329_v22  ;;  %v1461_v35 = vpop.f32.mrb[39].mxu0  ;;  %v1550_v38 = vpop.f32.mrb[39].mxu1  ;;  %2031 = vmatpush1.bf16.msra.mxu0 %v2030_v15  ;;  %2039 = vmatpush1.bf16.msra.mxu1 %v2038_v16 }
 0x533   : > { %v1462_v39 = vadd.f32 %v1461_v35, %v1329_v22  ;;  %v1551_v23 = vadd.f32 %v1550_v38, %v1329_v22 }
 0x534   : > { %v1565_v32 = vmax.f32 %v1460_v33, 0.0  ;;  %v1567_v36 = vmax.f32 %v1549_v34, 0.0 }
 0x535   : > { %v1566_v43 = vmax.f32 %v1462_v39, 0.0  ;;  %v1568_v40 = vmax.f32 %v1551_v23, 0.0 }
 0x536   : > { %v2034_v42 = vpack.c.bf16 %v1565_v32, %v1561_v27  ;;  %v2042_v44 = vpack.c.bf16 %v1567_v36, %v1563_v28 }
 0x537   : > { %v2032_v46 = vpack.c.bf16 %v1566_v43, %v1562_v37  ;;  %v2040_v47 = vpack.c.bf16 %v1568_v40, %v1564_v41 }
 0x539   : > { %2033 = vmatprep.subr.bf16.mxu0 %v2032_v46  ;;  %2041 = vmatprep.subr.bf16.mxu1 %v2040_v47 }
 0x53a   : > { %2035 = vmatpush1.bf16.msra.mxu0 %v2034_v42  ;;  %2043 = vmatpush1.bf16.msra.mxu1 %v2042_v44 }
 0x53d   : > { %1923 = vmatmul.mubr.msk.f32.vlgmr.msra.gmra.mrb[40].mxu0 %vm325_vm0, %v1599_v49  ;;  %1924 = vmatmul.mubr.msk.f32.vlgmr.msra.gmra.mrb[40].mxu1 %vm325_vm0, %v1599_v49 }
 0x610   : > { %v1684_v59 = vpop.f32.mrb[40].mxu0  ;;  %v1755_v48 = vpop.f32.mrb[40].mxu1 }
 0x611   : > { %v1685_v56 = vadd.f32 %v1684_v59, %v1570_v53  ;;  %v1756_v60 = vadd.f32 %v1755_v48, %v1570_v53  ;;  %v1686_v50 = vpop.f32.mrb[41].mxu0  ;;  %v1757_v61 = vpop.f32.mrb[41].mxu1 }
 0x612   : > { %v1687_v52 = vadd.f32 %v1686_v50, %v1570_v53  ;;  %v1758_v63 = vadd.f32 %v1757_v61, %v1570_v53 }
 0x614   : > { %v1764_v0 = vcombine.low %v1685_v56, %v1687_v52  ;;  %v1765_v1 = vcombine.low %v1756_v60, %v1758_v63 }
 0x616   : > { %v1772_v2 = vrot.slane %v1764_v0, %v1771_v62  ;;  %v1779_v57 = vrot.slane %v1765_v1, %v1771_v62 }
 0x618   : > { %v1780_v3 = vcombine.low %v1772_v2, %v1779_v57 }
 0x61a   : > { %v1787_v4 = vrot.slane %v1780_v3, %v1771_v62 }
 0x61c   : > { %1793 = vst.msk [vmem:[%s246_s29] sm:$0xf] %vm1791_vm2, %v1787_v4 }
 0x61d   : > { %2109 = shalt.err (!%p2106_p5)
}
 0x61e   : > { %s2110_s11 = scalar_lea.hbm %s2529_s7, 64  ;;  %s2114_s15 = scalar_lea.hbm %s2577_s4, 128 }
 0x61f   : > { %p2111_p7 = scmp.ne.s32.totalorder %s2529_s7, %s2110_s11  ;;  %p2115_p12 = scmp.lt.u32.totalorder %s2529_s7, %s2577_s4 }
 0x620   : > { %p2116_p13 = scmp.lt.u32.totalorder %s2114_s15, %s2110_s11  ;;  %p2118_p1 = scmp.lt.u32.totalorder %s2110_s11, %s2529_s7 }
 0x621   : > { %p2112_p10 = pnand %p2111_p7, %p2235_p6 }
 0x622   : > { %p2117_p0 = por %p2116_p13, %p2115_p12 }
 0x623   : > { %p2113_p11 = pneg %p2112_p10 }
 0x624   : > { %p2119_p2 = por %p2118_p1, %p2117_p0 }
 0x626   : > { %p2120_p3 = pnand %p2119_p2, %p2113_p11 }
 0x628   : > { %2123 = shalt.err (!%p2120_p3)
}
 0x629   : > { %2044 = dma.vmem_to_hbm [thread:$0]  (%p2235_p6), %s2531_s30, 64, %s2529_s7, %s1795_s8  }
 0x62a PF: > { %s1821_s23 = sand.u32 1, %s2146_s17   ;;  %p2047_p4 = pnand %p1876_p9, %p2239_p8 }
 0x62b   : > { %s1822_s24 = scalar_lea.sflag [#allocation5], %s1821_s23 }
 0x62c   : > { %2141 = dma.done.wait (!%p2047_p4), %s1822_s24, 64  }
 0x62d   : > { %2143 = vsyncadd (!%p2047_p4), %s1822_s24, 4294967232  ;;  %p15_p5 = scmp.ge.s32.totalorder %s2220_s22, 4   ;;  %s2580_s17 = smov %s2150_s18 }
 0x62e   : > { %s2581_s18 = smov %s2154_s19  ;;  %s2582_s19 = smov %s2233_s25 }
 0x62f   : > { %s2583_s20 = smov %s2220_s22  ;;  %17 = sbr.rel (!%p15_p5) target bundleno = 5 (0x5), region = 99 }
 0x636   :  { %1827 = vsyncpa [#allocation5], 1 }
 0x637   :  { %1829 = vsyncpa [#allocation5 + $0x1], 1 }

</bundles_post_ra>
